<compile_context>
chip_gen: v7x
topology: tpu7x:2x2x1
jax: 0.10.0
libtpu: 0.0.40
codegen_flags: <defaults>
</compile_context>

<pallas_src>
import jax
import jax.numpy as jnp
from jax.experimental import pallas as pl
from jax.experimental.pallas import tpu as pltpu

IN_FEATURES = 60
OUT_FEATURES = 5
TB_MAX = 8192          # max rows per batch tile (multiple of 8)


def _round_up(x, m):
    return ((x + m - 1) // m) * m


def _linear_sigmoid_kernel(x_ref, w_ref, b_ref, o_ref):
    # x_ref: (tb, 60), w_ref: (60, 5), b_ref: (1, 5), o_ref: (tb, 5)
    z = jnp.dot(x_ref[...], w_ref[...],
                preferred_element_type=jnp.float32) + b_ref[...]
    # sigmoid(z) = 1 / (1 + exp(-z)); exp on EUP, exact reciprocal keeps 1e-5 tol.
    o_ref[...] = pl.reciprocal(1.0 + jnp.exp(-z), approx=False).astype(o_ref.dtype)


def prepare_params(weight, bias):
    """weight: (5, 60) PyTorch layout, bias: (5,).

    Returns (w_t, b_row) pre-transposed / reshaped once, so the per-call path
    does no reshapes or transposes.
    """
    w_t = weight.astype(jnp.float32).T                      # (60, 5)
    b_row = bias.astype(jnp.float32).reshape(1, OUT_FEATURES)  # (1, 5)
    return w_t, b_row


def net_forward(x, w_t, b_row):
    """x: (B, 60) float32; w_t: (60, 5); b_row: (1, 5)."""
    B = x.shape[0]

    # Batch tile: multiple of 8, at least 2 grid steps when B allows it (so
    # v7x's second TensorCore gets work), capped at TB_MAX.  No padding of x:
    # the ragged last block is clamped/masked by Pallas on writeback.
    tb = min(TB_MAX, _round_up(max(pl.cdiv(max(B, 1), 2), 1), 8))
    grid = (pl.cdiv(B, tb),)

    bytes_accessed = (B * IN_FEATURES * 4 + B * OUT_FEATURES * 4
                      + IN_FEATURES * OUT_FEATURES * 4 + OUT_FEATURES * 4)

    out = pl.pallas_call(
        _linear_sigmoid_kernel,
        out_shape=jax.ShapeDtypeStruct((B, OUT_FEATURES), jnp.float32),
        grid_spec=pltpu.PrefetchScalarGridSpec(
            num_scalar_prefetch=0,
            grid=grid,
            in_specs=[
                pl.BlockSpec((tb, IN_FEATURES), lambda i: (i, 0)),
                pl.BlockSpec((IN_FEATURES, OUT_FEATURES), lambda i: (0, 0)),
                pl.BlockSpec((1, OUT_FEATURES), lambda i: (0, 0)),
            ],
            out_specs=pl.BlockSpec((tb, OUT_FEATURES), lambda i: (i, 0)),
        ),
        compiler_params=pltpu.CompilerParams(
            dimension_semantics=("parallel",),   # shard batch tiles across TCs (v7x)
        ),
        cost_estimate=pl.CostEstimate(
            flops=2 * B * IN_FEATURES * OUT_FEATURES,
            transcendentals=B * OUT_FEATURES,
            bytes_accessed=bytes_accessed,
        ),
    )(x, w_t, b_row)

    return out


if __name__ == "__main__":
    key = jax.random.PRNGKey(0)
    kx, kw, kb = jax.random.split(key, 3)

    batch = 8
    x = jax.random.normal(kx, (batch, IN_FEATURES), dtype=jnp.float32)

    # Deterministic parameter init mimicking nn.Linear default (+/- 1/sqrt(fan_in)).
    bound = 1.0 / jnp.sqrt(jnp.float32(IN_FEATURES))
    weight = jax.random.uniform(kw, (OUT_FEATURES, IN_FEATURES),
                                minval=-bound, maxval=bound, dtype=jnp.float32)
    bias = jax.random.uniform(kb, (OUT_FEATURES,),
                              minval=-bound, maxval=bound, dtype=jnp.float32)

    # Hoisted, one-time parameter preparation (transpose + reshape).
    w_t, b_row = prepare_params(weight, bias)

    out = net_forward(x, w_t, b_row)
    out = jax.block_until_ready(out)

    # Reference check in plain JAX.
    ref = jax.nn.sigmoid(x @ weight.T + bias)
    assert out.shape == (batch, OUT_FEATURES)
    assert jnp.allclose(out, ref, atol=1e-5, rtol=1e-5)

    print("KERNEL_OK")
</pallas_src>

<mosaic_0001>
module attributes {stable_mosaic.version = 11 : i64} {
  func.func @_linear_sigmoid_kernel(%arg0: i32, %arg1: memref<8x60xf32, #tpu.memory_space<vmem>>, %arg2: memref<60x5xf32, #tpu.memory_space<vmem>>, %arg3: memref<1x5xf32, #tpu.memory_space<vmem>>, %arg4: memref<8x5xf32, #tpu.memory_space<vmem>>) attributes {dimension_semantics = [#tpu.dimension_semantics<parallel>], iteration_bounds = array<i64: 1>, scalar_prefetch = 0 : i64, scratch_operands = 0 : i64, tpu.core_type = #tpu.core_type<tc>, window_params = [{transform_indices = @transform_0, window_bounds = array<i64: 8, 60>}, {pipeline_mode = #tpu.pipeline_mode<synchronous>, transform_indices = @transform_1, window_bounds = array<i64: 60, 5>}, {pipeline_mode = #tpu.pipeline_mode<synchronous>, transform_indices = @transform_2, window_bounds = array<i64: 1, 5>}, {transform_indices = @transform_3, window_bounds = array<i64: 8, 5>}]} {
    %c0 = arith.constant 0 : index
    %c0_0 = arith.constant 0 : index
    %0 = vector.load %arg1[%c0, %c0_0] : memref<8x60xf32, #tpu.memory_space<vmem>>, vector<8x60xf32>
    %c0_1 = arith.constant 0 : index
    %c0_2 = arith.constant 0 : index
    %1 = vector.load %arg2[%c0_1, %c0_2] : memref<60x5xf32, #tpu.memory_space<vmem>>, vector<60x5xf32>
    %cst = arith.constant dense<0.000000e+00> : vector<8x5xf32>
    %2 = tpu.matmul %0, %1, %cst {dimension_numbers = #tpu.dot_dimension_numbers<[1], [0], [0], [1], [0, 0, 1, 1], [], []>} : vector<8x60xf32>, vector<60x5xf32>, vector<8x5xf32> -> vector<8x5xf32>
    %c0_3 = arith.constant 0 : index
    %c0_4 = arith.constant 0 : index
    %3 = vector.load %arg3[%c0_3, %c0_4] : memref<1x5xf32, #tpu.memory_space<vmem>>, vector<1x5xf32>
    %4 = vector.broadcast %3 : vector<1x5xf32> to vector<8x5xf32>
    %5 = arith.addf %2, %4 : vector<8x5xf32>
    %cst_5 = arith.constant 0.000000e+00 : f32
    %6 = vector.broadcast %cst_5 : f32 to vector<8x5xf32>
    %7 = arith.subf %6, %5 : vector<8x5xf32>
    %8 = math.exp %7 : vector<8x5xf32>
    %cst_6 = arith.constant 1.000000e+00 : f32
    %9 = vector.broadcast %cst_6 : f32 to vector<8x5xf32>
    %10 = arith.addf %9, %8 : vector<8x5xf32>
    %11 = tpu.reciprocal %10 : vector<8x5xf32> -> vector<8x5xf32>
    %c0_7 = arith.constant 0 : index
    %c0_8 = arith.constant 0 : index
    %12 = vector.load %arg4[%c0_7, %c0_8] : memref<8x5xf32, #tpu.memory_space<vmem>>, vector<8x5xf32>
    tpu.vector_store %arg4[%c0_7, %c0_8], %11 {strides = array<i32>} : memref<8x5xf32, #tpu.memory_space<vmem>>, vector<8x5xf32>,
    return
  }
  func.func @transform_0(%arg0: i32) -> (i32, i32) {
    %c0_i32 = arith.constant 0 : i32
    %c0_i32_0 = arith.constant 0 : i32
    return %arg0, %c0_i32 : i32, i32
  }
  func.func @transform_1(%arg0: i32) -> (i32, i32) {
    %c0_i32 = arith.constant 0 : i32
    %c0_i32_0 = arith.constant 0 : i32
    %c0_i32_1 = arith.constant 0 : i32
    return %c0_i32, %c0_i32_0 : i32, i32
  }
  func.func @transform_2(%arg0: i32) -> (i32, i32) {
    %c0_i32 = arith.constant 0 : i32
    %c0_i32_0 = arith.constant 0 : i32
    %c0_i32_1 = arith.constant 0 : i32
    return %c0_i32, %c0_i32_0 : i32, i32
  }
  func.func @transform_3(%arg0: i32) -> (i32, i32) {
    %c0_i32 = arith.constant 0 : i32
    %c0_i32_0 = arith.constant 0 : i32
    return %arg0, %c0_i32 : i32, i32
  }
}

</mosaic_0001>

<bundles_post_ra>
// kernel: tpu_custom_call.1
= control target key start
LH: loop header
LB: loop body
LE: loop exit
PB: predicated region body
PF: predicated region fallthrough
CT: control target
= control target key end

     0   :  { %v207_v3 = vmov 0.0|0.0   ;;  %vm208_vm0 = vmmov 0   ;;  %v209_v6 = vmov 0.0   ;;  %s274_s0 = inlined_call_operand.vmem [shape: f32[8,60], index: 0, kind: input, shape index: {}]   ;;  %s275_s1 = inlined_call_operand.vmem [shape: f32[60,5], index: 1, kind: input, shape index: {}]   ;;  %s276_s2 = inlined_call_operand.vmem [shape: f32[1,5], index: 2, kind: input, shape index: {}]   ;;  %s277_s3 = inlined_call_operand.hbm [shape: f32[8,5], index: 3, kind: output, shape index: {}]  }
   0x1   :  { %v16_v0 = vld [vmem:[%s275_s1] sm:$0xff]  ;;  %v17_v1 = vld [vmem:[%s275_s1 + $0x8] sm:$0xff]  ;;  %v18_v2 = vld [vmem:[%s275_s1 + $0x10] sm:$0xff]  ;;  %161 = vmatprep.subr.bf16.mxu0 %v207_v3  ;;  %158 = vmatprep.mubr.msk.f32.mxu0 %vm208_vm0, %v209_v6 }
   0x2   :  { %v162_v4 = vpack.c.bf16 %v17_v1, %v16_v0  ;;  %v19_v5 = vld [vmem:[%s275_s1 + $0x18] sm:$0xff] }
   0x3   :  { %v165_v7 = vpack.c.bf16 %v19_v5, %v18_v2 }
   0x4   :  { %163 = vmatpush3.bf16.msra.mxu0 %v162_v4 }
   0x5   :  { %8 = vsyncpa [#allocation3], 0  ;;  %164 = vmatprep.subr.bf16.mxu0 %v207_v3  ;;  %v20_v8 = vld [vmem:[%s275_s1 + $0x20] sm:$0xff]  ;;  %v21_v9 = vld [vmem:[%s275_s1 + $0x28] sm:$0xff]  ;;  %vm35_vm1 = vcmask 1043456   ;;  %vm210_vm2 = vmmov 1  }
   0x6   :  { %v168_v10 = vpack.c.bf16 %v21_v9, %v20_v8  ;;  %v22_v11 = vld [vmem:[%s275_s1 + $0x30] sm:$0xff]  ;;  %v23_v12 = vld [vmem:[%s275_s1 + $0x38] sm:$0xf]  ;;  %vm172_vm3 = vmpackc.low %vm35_vm1, %vm210_vm2  ;;  %vm31_vm4 = vcmask 490496   ;;  %s211_s1 = smov [#allocation2]   ;;  %vm114_vm5 = vcmask 39936  }
   0x7   :  { %v171_v13 = vpack.c.bf16 %v23_v12, %v22_v11  ;;  %v15_v14 = vld [vmem:[%s274_s0] sm:$0xff]  ;;  %s122_s5 = sshll.u32 %s211_s1, 4  ;;  %s123_s5 = int_to_ptr.vmem [resolvable:$true] %s122_s5 }
   0x8   :  { %166 = vmatpush3.bf16.msra.mxu0 %v165_v7  ;;  %v130_v15 = vld [vmem:[%s276_s2] ss:$0 sm:$0xff]  ;;  %s183_s0 = scalar_lea.vmem %s123_s5, 128  ;;  %p188_p1 = scmp.lt.s32.totalorder %s123_s5, %s123_s5 }
   0x9   :  { %167 = vmatprep.subr.bf16.mxu0 %v207_v3  ;;  %p184_p0 = scmp.ne.s32.totalorder %s123_s5, %s183_s0  ;;  %p189_p2 = scmp.lt.s32.totalorder %s183_s0, %s183_s0 }
   0xb   :  { %p190_p3 = por %p189_p2, %p188_p1 }
   0xc   :  { %169 = vmatpush3.bf16.msra.mxu0 %v168_v10 }
   0xd   :  { %170 = vmatprep.subr.bf16.mxu0 %v207_v3  ;;  %p191_p4 = pnand %p190_p3, %p184_p0 }
  0x10   :  { %173 = vmatpush3.bf16.msk.msra.mxu0 %vm172_vm3, %v171_v13 }
  0x13   :  { %159 = vmatmul.mubr.msk.f32.vlgmr.msra.gmra.mrb[0].mxu0 %vm31_vm4, %v15_v14 }
  0xe6   :  { %v105_v16 = vpop.f32.mrb[0].mxu0 }
  0xe7   :  { %v106_v17 = vadd.f32 %v130_v15, %v105_v16  ;;  %v160_v18 = vpop.f32.mrb[1].mxu0 }
  0xe9   :  { %v109_v19 = vsub.f32 0.0, %v106_v17 }
  0xeb   :  { %v110_v20 = vmul.f32 1.442695, %v109_v19 }
  0xed   :  { %179 = vpow2.f32 %v110_v20 }
  0xf7   :  { %v180_v21 = vpop.eup %179 }
  0xf8   :  { %v112_v22 = vadd.f32 1.0, %v180_v21 }
  0xfa   :  { %181 = vrcp.f32 %v112_v22 }
 0x104   :  { %v182_v23 = vpop.eup %181 }
 0x105   :  { %115 = vst.msk [vmem:[#allocation2] sm:$0xff] %vm114_vm5, %v182_v23 }
 0x106   :  { %194 = shalt.err (!%p191_p4)
}
 0x107   :  { %s195_s7 = scalar_lea.hbm %s277_s3, 128 }
 0x108   :  { %p196_p5 = scmp.ne.s32.totalorder %s277_s3, %s195_s7  ;;  %p199_p6 = scmp.lt.u32.totalorder %s195_s7, %s277_s3 }
 0x10a   :  { %p201_p7 = pnand %p199_p6, %p196_p5 }
 0x10c   :  { %204 = shalt.err (!%p201_p7)
}
 0x10d   :  { %125 = dma.vmem_to_hbm [thread:$0]  %s123_s5, 128, %s277_s3, [#allocation3]  }
 0x10e   :  { %205 = dma.done.wait [#allocation3], 128  }
 0x10f   :  { %206 = vsyncadd [#allocation3], 4294967168 }
 0x110   :  { %129 = vsyncpa [#allocation3], 1 }

</bundles_post_ra>
